<compile_context>
chip_gen: v5e
topology: v5e:2x2
jax: 0.10.0
libtpu: 0.0.40
codegen_flags: <defaults>
</compile_context>

<pallas_src>
import functools

import jax
import jax.numpy as jnp
from jax.experimental import pallas as pl
from jax.experimental.pallas import tpu as pltpu

KH = KW = 3  # kernel_size=3, stride=1, padding=1 (static)


def cir_kernel(wp, x_ref, w_ref, b_ref, o_ref, patch_ref):
    """One batch element per grid step.

    wp:        padded row width (W + 2), static Python int.
    x_ref:     (1, Cin, Lpad)   row-major-flattened, spatially padded image (f32)
    w_ref:     (Cout, 9*Cin)    bf16 weights, tap-major / channel-minor
    b_ref:     (Cout, 1)        f32 bias
    o_ref:     (1, Cout, L)     L = H * (W + 2); junk columns stripped outside
    patch_ref: (9*Cin, L) f32   im2col scratch
    """
    c_in = x_ref.shape[1]
    l_out = o_ref.shape[2]

    # Build the im2col patch: tap (kh, kw) is the flattened padded image
    # shifted by kh*Wp + kw lanes -> contiguous windows, no per-tap reshape.
    for kh in range(KH):
        for kw in range(KW):
            t = kh * KW + kw
            off = kh * wp + kw
            patch_ref[t * c_in:(t + 1) * c_in, :] = x_ref[0, :, off:off + l_out]

    patch = patch_ref[...].astype(jnp.bfloat16)                  # (9*Cin, L)
    acc = jnp.dot(w_ref[...], patch,
                  preferred_element_type=jnp.float32)            # (Cout, L) f32
    acc = jnp.maximum(acc + b_ref[...], 0.0)                     # bias + ReLU
    o_ref[...] = acc.reshape(1, *acc.shape).astype(o_ref.dtype)


def cir_forward(x_nchw, weight, bias):
    """x_nchw: (N, Cin, H, W); weight: (Cout, Cin, 3, 3); bias: (Cout,).

    Returns (N, Cout, H, W), matching
    nn.Sequential(nn.Conv2d(Cin, Cout, 3, 1, 1), nn.ReLU()).
    """
    N, c_in, H, W = x_nchw.shape
    c_out = weight.shape[0]
    wp = W + 2                      # padded row width
    l_out = H * wp                  # flat output length (2 junk cols per row)
    l_pad = (H + 3) * wp            # extra bottom zero row so the (2,2) tap
                                    # window never reads past the buffer

    # Spatial zero-pad (1 left/right, 1 top, 2 bottom) + free row-major flatten.
    x_pad = jnp.pad(x_nchw, ((0, 0), (0, 0), (1, 2), (1, 1)))
    x_flat = x_pad.reshape(N, c_in, l_pad)

    # (Cout, Cin, KH, KW) -> (Cout, KH*KW*Cin), tap-major / channel-minor, bf16.
    w2 = jnp.transpose(weight, (0, 2, 3, 1)).reshape(c_out, KH * KW * c_in)
    w2 = w2.astype(jnp.bfloat16)
    b2 = bias.reshape(c_out, 1).astype(jnp.float32)

    flops = 2 * N * c_out * KH * KW * c_in * l_out
    bytes_accessed = (x_flat.size * x_flat.dtype.itemsize
                      + w2.size * 2 + b2.size * 4
                      + N * c_out * l_out * x_nchw.dtype.itemsize)

    out_flat = pl.pallas_call(
        functools.partial(cir_kernel, wp),
        out_shape=jax.ShapeDtypeStruct((N, c_out, l_out), x_nchw.dtype),
        grid_spec=pltpu.PrefetchScalarGridSpec(
            num_scalar_prefetch=0,
            grid=(N,),
            in_specs=[
                pl.BlockSpec((1, c_in, l_pad), lambda n: (n, 0, 0)),
                pl.BlockSpec((c_out, KH * KW * c_in), lambda n: (0, 0)),
                pl.BlockSpec((c_out, 1), lambda n: (0, 0)),
            ],
            out_specs=pl.BlockSpec((1, c_out, l_out), lambda n: (n, 0, 0)),
            scratch_shapes=[pltpu.VMEM((KH * KW * c_in, l_out), jnp.float32)],
        ),
        compiler_params=pltpu.CompilerParams(
            dimension_semantics=("parallel",)),
        cost_estimate=pl.CostEstimate(flops=flops, transcendentals=0,
                                      bytes_accessed=bytes_accessed),
    )(x_flat, w2, b2)

    # (N, Cout, H*(W+2)) -> strip the 2 junk columns per row -> (N, Cout, H, W).
    return out_flat.reshape(N, c_out, H, wp)[:, :, :, :W]


if __name__ == "__main__":
    key = jax.random.PRNGKey(0)
    kx, kwt, kb = jax.random.split(key, 3)

    N, c_in, c_out, H, W = 2, 4, 8, 16, 16
    x = jax.random.normal(kx, (N, c_in, H, W), dtype=jnp.float32)
    # Deterministic synthetic params (shapes match nn.Conv2d(4, 8, 3, 1, 1)).
    weight = jax.random.normal(kwt, (c_out, c_in, KH, KW), dtype=jnp.float32) * 0.1
    bias = jax.random.normal(kb, (c_out,), dtype=jnp.float32) * 0.1

    out = jax.block_until_ready(cir_forward(x, weight, bias))

    # Reference with the same bf16 input rounding and f32 accumulation.
    ref = jax.lax.conv_general_dilated(
        x.astype(jnp.bfloat16), weight.astype(jnp.bfloat16),
        window_strides=(1, 1), padding=((1, 1), (1, 1)),
        dimension_numbers=("NCHW", "OIHW", "NCHW"),
        preferred_element_type=jnp.float32)
    ref = jnp.maximum(ref + bias.reshape(1, c_out, 1, 1), 0.0)

    assert out.shape == (N, c_out, H, W)
    assert jnp.allclose(out, ref.astype(out.dtype), atol=1e-2, rtol=1e-2), (
        float(jnp.max(jnp.abs(out - ref))))
    print("KERNEL_OK")
</pallas_src>

<mosaic_0001>
module attributes {stable_mosaic.version = 11 : i64} {
  func.func @cir_kernel(%arg0: i32, %arg1: memref<1x4x342xf32, #tpu.memory_space<vmem>>, %arg2: memref<8x36xbf16, #tpu.memory_space<vmem>>, %arg3: memref<8x1xf32, #tpu.memory_space<vmem>>, %arg4: memref<1x8x288xf32, #tpu.memory_space<vmem>>, %arg5: memref<36x288xf32, #tpu.memory_space<vmem>>) attributes {dimension_semantics = [#tpu.dimension_semantics<parallel>], iteration_bounds = array<i64: 2>, scalar_prefetch = 0 : i64, scratch_operands = 1 : i64, tpu.core_type = #tpu.core_type<tc>, window_params = [{transform_indices = @transform_0, window_bounds = array<i64: 1, 4, 342>}, {pipeline_mode = #tpu.pipeline_mode<synchronous>, transform_indices = @transform_1, window_bounds = array<i64: 8, 36>}, {pipeline_mode = #tpu.pipeline_mode<synchronous>, transform_indices = @transform_2, window_bounds = array<i64: 8, 1>}, {transform_indices = @transform_3, window_bounds = array<i64: 1, 8, 288>}]} {
    %c0 = arith.constant 0 : index
    %c0_0 = arith.constant 0 : index
    %c0_1 = arith.constant 0 : index
    %0 = vector.load %arg1[%c0, %c0_0, %c0_1] : memref<1x4x342xf32, #tpu.memory_space<vmem>>, vector<1x4x288xf32>
    %1 = vector.shape_cast %0 : vector<1x4x288xf32> to vector<4x288xf32>
    %c0_2 = arith.constant 0 : index
    %c0_3 = arith.constant 0 : index
    %2 = vector.load %arg5[%c0_2, %c0_3] : memref<36x288xf32, #tpu.memory_space<vmem>>, vector<4x288xf32>
    tpu.vector_store %arg5[%c0_2, %c0_3], %1 {strides = array<i32>} : memref<36x288xf32, #tpu.memory_space<vmem>>, vector<4x288xf32>,
    %c0_4 = arith.constant 0 : index
    %c0_5 = arith.constant 0 : index
    %c1 = arith.constant 1 : index
    %3 = vector.load %arg1[%c0_4, %c0_5, %c1] : memref<1x4x342xf32, #tpu.memory_space<vmem>>, vector<1x4x288xf32>
    %4 = vector.shape_cast %3 : vector<1x4x288xf32> to vector<4x288xf32>
    %c4 = arith.constant 4 : index
    %c0_6 = arith.constant 0 : index
    %5 = vector.load %arg5[%c4, %c0_6] : memref<36x288xf32, #tpu.memory_space<vmem>>, vector<4x288xf32>
    tpu.vector_store %arg5[%c4, %c0_6], %4 {strides = array<i32>} : memref<36x288xf32, #tpu.memory_space<vmem>>, vector<4x288xf32>,
    %c0_7 = arith.constant 0 : index
    %c0_8 = arith.constant 0 : index
    %c2 = arith.constant 2 : index
    %6 = vector.load %arg1[%c0_7, %c0_8, %c2] : memref<1x4x342xf32, #tpu.memory_space<vmem>>, vector<1x4x288xf32>
    %7 = vector.shape_cast %6 : vector<1x4x288xf32> to vector<4x288xf32>
    %c8 = arith.constant 8 : index
    %c0_9 = arith.constant 0 : index
    %8 = vector.load %arg5[%c8, %c0_9] : memref<36x288xf32, #tpu.memory_space<vmem>>, vector<4x288xf32>
    tpu.vector_store %arg5[%c8, %c0_9], %7 {strides = array<i32>} : memref<36x288xf32, #tpu.memory_space<vmem>>, vector<4x288xf32>,
    %c0_10 = arith.constant 0 : index
    %c0_11 = arith.constant 0 : index
    %c18 = arith.constant 18 : index
    %9 = vector.load %arg1[%c0_10, %c0_11, %c18] : memref<1x4x342xf32, #tpu.memory_space<vmem>>, vector<1x4x288xf32>
    %10 = vector.shape_cast %9 : vector<1x4x288xf32> to vector<4x288xf32>
    %c12 = arith.constant 12 : index
    %c0_12 = arith.constant 0 : index
    %11 = vector.load %arg5[%c12, %c0_12] : memref<36x288xf32, #tpu.memory_space<vmem>>, vector<4x288xf32>
    tpu.vector_store %arg5[%c12, %c0_12], %10 {strides = array<i32>} : memref<36x288xf32, #tpu.memory_space<vmem>>, vector<4x288xf32>,
    %c0_13 = arith.constant 0 : index
    %c0_14 = arith.constant 0 : index
    %c19 = arith.constant 19 : index
    %12 = vector.load %arg1[%c0_13, %c0_14, %c19] : memref<1x4x342xf32, #tpu.memory_space<vmem>>, vector<1x4x288xf32>
    %13 = vector.shape_cast %12 : vector<1x4x288xf32> to vector<4x288xf32>
    %c16 = arith.constant 16 : index
    %c0_15 = arith.constant 0 : index
    %14 = vector.load %arg5[%c16, %c0_15] : memref<36x288xf32, #tpu.memory_space<vmem>>, vector<4x288xf32>
    tpu.vector_store %arg5[%c16, %c0_15], %13 {strides = array<i32>} : memref<36x288xf32, #tpu.memory_space<vmem>>, vector<4x288xf32>,
    %c0_16 = arith.constant 0 : index
    %c0_17 = arith.constant 0 : index
    %c20 = arith.constant 20 : index
    %15 = vector.load %arg1[%c0_16, %c0_17, %c20] : memref<1x4x342xf32, #tpu.memory_space<vmem>>, vector<1x4x288xf32>
    %16 = vector.shape_cast %15 : vector<1x4x288xf32> to vector<4x288xf32>
    %c20_18 = arith.constant 20 : index
    %c0_19 = arith.constant 0 : index
    %17 = vector.load %arg5[%c20_18, %c0_19] : memref<36x288xf32, #tpu.memory_space<vmem>>, vector<4x288xf32>
    tpu.vector_store %arg5[%c20_18, %c0_19], %16 {strides = array<i32>} : memref<36x288xf32, #tpu.memory_space<vmem>>, vector<4x288xf32>,
    %c0_20 = arith.constant 0 : index
    %c0_21 = arith.constant 0 : index
    %c36 = arith.constant 36 : index
    %18 = vector.load %arg1[%c0_20, %c0_21, %c36] : memref<1x4x342xf32, #tpu.memory_space<vmem>>, vector<1x4x288xf32>
    %19 = vector.shape_cast %18 : vector<1x4x288xf32> to vector<4x288xf32>
    %c24 = arith.constant 24 : index
    %c0_22 = arith.constant 0 : index
    %20 = vector.load %arg5[%c24, %c0_22] : memref<36x288xf32, #tpu.memory_space<vmem>>, vector<4x288xf32>
    tpu.vector_store %arg5[%c24, %c0_22], %19 {strides = array<i32>} : memref<36x288xf32, #tpu.memory_space<vmem>>, vector<4x288xf32>,
    %c0_23 = arith.constant 0 : index
    %c0_24 = arith.constant 0 : index
    %c37 = arith.constant 37 : index
    %21 = vector.load %arg1[%c0_23, %c0_24, %c37] : memref<1x4x342xf32, #tpu.memory_space<vmem>>, vector<1x4x288xf32>
    %22 = vector.shape_cast %21 : vector<1x4x288xf32> to vector<4x288xf32>
    %c28 = arith.constant 28 : index
    %c0_25 = arith.constant 0 : index
    %23 = vector.load %arg5[%c28, %c0_25] : memref<36x288xf32, #tpu.memory_space<vmem>>, vector<4x288xf32>
    tpu.vector_store %arg5[%c28, %c0_25], %22 {strides = array<i32>} : memref<36x288xf32, #tpu.memory_space<vmem>>, vector<4x288xf32>,
    %c0_26 = arith.constant 0 : index
    %c0_27 = arith.constant 0 : index
    %c38 = arith.constant 38 : index
    %24 = vector.load %arg1[%c0_26, %c0_27, %c38] : memref<1x4x342xf32, #tpu.memory_space<vmem>>, vector<1x4x288xf32>
    %25 = vector.shape_cast %24 : vector<1x4x288xf32> to vector<4x288xf32>
    %c32 = arith.constant 32 : index
    %c0_28 = arith.constant 0 : index
    %26 = vector.load %arg5[%c32, %c0_28] : memref<36x288xf32, #tpu.memory_space<vmem>>, vector<4x288xf32>
    tpu.vector_store %arg5[%c32, %c0_28], %25 {strides = array<i32>} : memref<36x288xf32, #tpu.memory_space<vmem>>, vector<4x288xf32>,
    %c0_29 = arith.constant 0 : index
    %c0_30 = arith.constant 0 : index
    %27 = vector.load %arg5[%c0_29, %c0_30] : memref<36x288xf32, #tpu.memory_space<vmem>>, vector<36x288xf32>
    %28 = arith.truncf %27 : vector<36x288xf32> to vector<36x288xbf16>
    %c0_31 = arith.constant 0 : index
    %c0_32 = arith.constant 0 : index
    %29 = vector.load %arg2[%c0_31, %c0_32] : memref<8x36xbf16, #tpu.memory_space<vmem>>, vector<8x36xbf16>
    %cst = arith.constant dense<0.000000e+00> : vector<8x288xf32>
    %30 = tpu.matmul %29, %28, %cst {dimension_numbers = #tpu.dot_dimension_numbers<[1], [0], [0], [1], [0, 0, 1, 1], [], []>} : vector<8x36xbf16>, vector<36x288xbf16>, vector<8x288xf32> -> vector<8x288xf32>
    %c0_33 = arith.constant 0 : index
    %c0_34 = arith.constant 0 : index
    %31 = vector.load %arg3[%c0_33, %c0_34] : memref<8x1xf32, #tpu.memory_space<vmem>>, vector<8x1xf32>
    %32 = vector.broadcast %31 : vector<8x1xf32> to vector<8x288xf32>
    %33 = arith.addf %30, %32 : vector<8x288xf32>
    %cst_35 = arith.constant 0.000000e+00 : f32
    %34 = vector.broadcast %cst_35 : f32 to vector<8x288xf32>
    %35 = arith.maximumf %33, %34 : vector<8x288xf32>
    %36 = vector.shape_cast %35 : vector<8x288xf32> to vector<1x8x288xf32>
    %c0_36 = arith.constant 0 : index
    %c0_37 = arith.constant 0 : index
    %c0_38 = arith.constant 0 : index
    %37 = vector.load %arg4[%c0_36, %c0_37, %c0_38] : memref<1x8x288xf32, #tpu.memory_space<vmem>>, vector<1x8x288xf32>
    tpu.vector_store %arg4[%c0_36, %c0_37, %c0_38], %36 {strides = array<i32>} : memref<1x8x288xf32, #tpu.memory_space<vmem>>, vector<1x8x288xf32>,
    return
  }
  func.func @transform_0(%arg0: i32) -> (i32, i32, i32) {
    %c0_i32 = arith.constant 0 : i32
    %c0_i32_0 = arith.constant 0 : i32
    %c0_i32_1 = arith.constant 0 : i32
    return %arg0, %c0_i32, %c0_i32_0 : i32, i32, i32
  }
  func.func @transform_1(%arg0: i32) -> (i32, i32) {
    %c0_i32 = arith.constant 0 : i32
    %c0_i32_0 = arith.constant 0 : i32
    %c0_i32_1 = arith.constant 0 : i32
    return %c0_i32, %c0_i32_0 : i32, i32
  }
  func.func @transform_2(%arg0: i32) -> (i32, i32) {
    %c0_i32 = arith.constant 0 : i32
    %c0_i32_0 = arith.constant 0 : i32
    %c0_i32_1 = arith.constant 0 : i32
    return %c0_i32, %c0_i32_0 : i32, i32
  }
  func.func @transform_3(%arg0: i32) -> (i32, i32, i32) {
    %c0_i32 = arith.constant 0 : i32
    %c0_i32_0 = arith.constant 0 : i32
    %c0_i32_1 = arith.constant 0 : i32
    return %arg0, %c0_i32, %c0_i32_0 : i32, i32, i32
  }
}

</mosaic_0001>

<bundles_post_ra>
// kernel: tpu_custom_call.1
= control target key start
LH: loop header
LB: loop body
LE: loop exit
PB: predicated region body
PF: predicated region fallthrough
CT: control target
= control target key end

     0   :  { %8 = vsyncpa [#allocation4], 0  ;;  %s986_s0 = inlined_call_operand.hbm [shape: f32[2,4,342], index: 0, kind: input, shape index: {}]   ;;  %s987_s1 = inlined_call_operand.vmem [shape: bf16[8,36], index: 1, kind: input, shape index: {}]   ;;  %s988_s2 = inlined_call_operand.vmem [shape: f32[8,1], index: 2, kind: input, shape index: {}]   ;;  %s989_s3 = inlined_call_operand.hbm [shape: f32[2,8,288], index: 3, kind: output, shape index: {}]  }
   0x1   :  { %10 = vsyncpa [#allocation4 + $0x1], 0 }
   0x2   :  { %11 = vsyncpa [#allocation5], 0 }
   0x3   :  { %13 = vsyncpa [#allocation5 + $0x1], 0  ;;  %s789_s12 = smov 0   ;;  %s791_s13 = smov 0  }
   0x4   :  { %s793_s14 = smov 0   ;;  %s795_s15 = smov 0  }
   0x5 LB: > { %s810_s16 = sadd.s32 4294967295, %s758_s15   ;;  %s590_s17 = sadd.s32 4294967294, %s758_s15   ;;  %s758_s15 = sphi %s795_s15, %s997_s15   ;;  %s754_s14 = sphi %s793_s14, %s996_s14   ;;  %s750_s13 = sphi %s791_s13, %s995_s13   ;;  %s746_s12 = sphi %s789_s12, %s994_s12  }
   0x6   : > { %s814_s18 = sadd.s32 1, %s758_s15   ;;  %s26_s19 = sadd.s32 1, %s754_s14 }
   0x7   : > { %s23_s20 = ssub.s32 %s758_s15, %s814_s18  ;;  %p33_p0 = scmp.ne.s32.totalorder %s754_s14, %s750_s13 }
   0x8   : > { %p24_p1 = scmp.eq.s32.totalorder %s23_s20, 0  ;;  %p34_p2 = scmp.eq.s32.totalorder %s758_s15, 0 }
   0x9   : > { %p39_p3 = scmp.ne.s32.totalorder %s750_s13, %s746_s12  ;;  %p40_p4 = scmp.eq.s32.totalorder %s810_s16, 0 }
   0xa   : > { %s826_s21 = scalar_select %p24_p1, %s754_s14, %s26_s19  }
   0xb   : > { %p35_p5 = por %p34_p2, %p33_p0  ;;  %p828_p6 = por %p40_p4, %p39_p3 }
   0xc   : > { %p105_p7 = scmp.eq.s32.totalorder %s810_s16, 1  ;;  %p111_p8 = scmp.eq.s32.totalorder %s590_s17, 1 }
   0xd   : > { %p592_p9 = scmp.ge.s32.totalorder %s758_s15, 2  ;;  %p618_p10 = scmp.lt.s32.totalorder %s758_s15, 2 }
   0xe   : > { %p835_p11 = por %p105_p7, %p33_p0  ;;  %p839_p12 = por %p111_p8, %p39_p3 }
   0xf   : > { %s137_s25 = sand.u32 1, %s754_s14   ;;  %s602_s26 = smul.u32 12, %s758_s15 }
  0x10   : > { %s601_s27 = smul.u32 12, %s137_s25  ;;  %p848_p13 = pnand %p618_p10, %p35_p5 }
  0x11   : > { %s146_s30 = scalar_lea.hbm %s986_s0, %s602_s26  ;;  %s138_s8 = scalar_lea.sflag [#allocation4], %s137_s25 }
  0x12   : > { %s148_s5 = sshll.u32 %s146_s30, 4  ;;  %s141_s6 = scalar_lea.vmem [#allocation3], %s601_s27  ;;  %s149_s5 = int_to_ptr.hbm [resolvable:$true] %s148_s5 }
  0x13   : > { %s150_s7 = sshll.u32 %s141_s6, 4  ;;  %s662_s9 = sshra.s32 %s149_s5, 4  ;;  %s151_s7 = int_to_ptr.vmem [resolvable:$true] %s150_s7  ;;  %s663_s9 = int_to_ptr.hbm [resolvable:$true] %s662_s9 }
  0x14   : > { %s664_s10 = scalar_lea.hbm %s663_s9, 12  ;;  %p666_p1 = pneg %p848_p13 }
  0x15   : > { %p665_p0 = scmp.ne.s32.totalorder %s663_s9, %s664_s10  ;;  %s669_s19 = scalar_lea.hbm %s986_s0, 24 }
  0x16   : > { %p670_p4 = scmp.lt.s32.totalorder %s663_s9, %s986_s0  ;;  %p671_p5 = scmp.lt.s32.totalorder %s669_s19, %s664_s10 }
  0x17   : > { %p667_p2 = pnand %p666_p1, %p665_p0 }
  0x18   : > { %p672_p7 = por %p671_p5, %p670_p4 }
  0x19   : > { %p668_p3 = pneg %p667_p2 }
  0x1b   : > { %p673_p8 = pnand %p672_p7, %p668_p3 }
  0x1d   : > { %676 = shalt.err (!%p673_p8)
}
  0x1e   : > { %613 = dma.hbm_to_vmem [thread:$0]  (!%p848_p13), %s149_s5, 192, %s151_s7, %s138_s8  }
  0x1f   : > { %p594_p10 = scmp.ge.s32.totalorder %s758_s15, 1  ;;  %p155_p0 = scmp.lt.s32.totalorder %s758_s15, 3 }
  0x21   : > { %p156_p1 = pnand %p594_p10, %p155_p0 }
  0x22   : > { %s865_s25 = sand.u32 (!%p156_p1), 1, %s750_s13  }
  0x23   : > { %159 = sbr.rel (%p156_p1) target bundleno = 402 (0x192), region = 32  ;;  %s162_s28 = scalar_lea.sflag (!%p156_p1), [#allocation4], %s865_s25 }
  0x24   : > { %s603_s27 = smul.u32 (!%p156_p1), 12, %s865_s25 }
  0x26   : > { %s869_s29 = scalar_lea.vmem (!%p156_p1), [#allocation3], %s603_s27 }
  0x28   : > { %737 = dma.done.wait (%p828_p6), %s162_s28, 192  }
  0x29   : > { %739 = vsyncadd (%p828_p6), %s162_s28, 4294967104  ;;  %v191_v0 = vld [vmem:[%s869_s29 + $0x8] sm:$0xf]  ;;  %v877_v1 = vld [vmem:[%s869_s29] sm:$0xff]  ;;  %s760_s22 = smov 127   ;;  %s761_s30 = smov 126  }
  0x2a   : > { %196 = vst [vmem:[#allocation1 + $0x10] ss:$2 sm:$0xff] %v191_v0  ;;  %v208_v2 = vld [vmem:[%s869_s29 + $0x8] sm:$0xf]  ;;  %s762_s4 = smov 110   ;;  %s763_s5 = smov 109  }
  0x2b   : > { %194 = vst [vmem:[#allocation1] ss:$2 sm:$0xff] %v877_v1  ;;  %v235_v6 = vld [vmem:[%s869_s29 + $0x8] sm:$0xf]  ;;  %s764_s6 = smov 108   ;;  %s765_s7 = smov 92  }
  0x2c   : > { %v260_v10 = vld [vmem:[%s869_s29 + $0x8] sm:$0xf]  ;;  %s766_s8 = smov 91   ;;  %vm205_vm0 = vcmask 257024   ;;  %s767_s9 = smov 90   ;;  %vm232_vm1 = vcmask 261124  }
  0x2d   : > { %v286_v14 = vld [vmem:[%s869_s29 + $0x8] sm:$0xf]  ;;  %vm301_vm2 = vcmask 891904   ;;  %vm378_vm3 = vcmask 744448   ;;  %vm327_vm4 = vcmask 883712   ;;  %vm352_vm5 = vcmask 752640  }
  0x2e   : > { %v311_v18 = vld [vmem:[%s869_s29 + $0x8] sm:$0xf]  ;;  %vm276_vm6 = vcmask 900096   ;;  %vm403_vm7 = vcmask 736256   ;;  %vm224_vm8 = vcmask 1039360   ;;  %vm447_vm9 = vcmask 1041408  }
  0x2f   : > { %v337_v22 = vld [vmem:[%s869_s29 + $0x8] sm:$0xf]  ;;  %vm443_vm10 = vcmask 293888   ;;  %vm250_vm11 = vcmask 1031168   ;;  %s604_s20 = smul.u32 24, %s865_s25  ;;  %vm501_vm12 = vcmask 261120  }
  0x30   : > { %v362_v26 = vld [vmem:[%s869_s29 + $0x8] sm:$0xf]  ;;  %s605_s26 = smul.u32 24, %s810_s16  ;;  %s504_s16 = scalar_lea.sflag [#allocation5], %s865_s25 }
  0x31   : > { %v881_v3 = vld.sshfl [vmem:[#allocation1 + $0x10] sm:$0xff pattern:$0x75316420]  ;;  %s188_s27 = scalar_lea.vmem [#allocation6], %s604_s20 }
  0x32   : > { %214 = vst [vmem:[#allocation1 + $0x11] ss:$2 sm:$0xff] %v208_v2  ;;  %v197_v4 = vld.sshfl [vmem:[#allocation1] sm:$0xff pattern:$0x75316420] }
  0x33   : > { %v198_v5 = vld.sshfl [vmem:[#allocation1 + $0x8] sm:$0xff pattern:$0x75316420]  ;;  %203 = vst [vmem:[#allocation2] sm:$0xf] %v197_v4 }
  0x34   : > { %212 = vst [vmem:[#allocation1 + $0x1] ss:$2 sm:$0xff] %v877_v1  ;;  %v388_v30 = vld [vmem:[%s869_s29 + $0x8] sm:$0xf] }
  0x35   : > { %204 = vst [vmem:[#allocation2 + $0x8] sm:$0xf] %v198_v5 }
  0x36   : > { %206 = vst.msk [vmem:[#allocation2 + $0x10] sm:$0xf] %vm205_vm0, %v881_v3  ;;  %v437_v3 = vld [vmem:[%s988_s2] sm:$0xff] }
  0x39   : > { %v217_v7 = vld.sshfl [vmem:[#allocation1 + $0x10] sm:$0xff pattern:$0x75316420] }
  0x3a   : > { %222 = vrot.lane.b32.xlu1 %v217_v7, %s760_s22  ;;  %240 = vst [vmem:[#allocation1 + $0x10] ss:$2 sm:$0xff] %v235_v6  ;;  %v768_v7 = vmov 0  }
  0x3b   : > { %v886_v8 = vld.sshfl [vmem:[#allocation1] sm:$0xff pattern:$0x75316420]  ;;  %v888_v9 = vld.sshfl [vmem:[#allocation1 + $0x8] sm:$0xff pattern:$0x75316420]  ;;  %661 = vset.pattern.permute.xlu0 %v768_v7 }
  0x3c   : > { %238 = vst [vmem:[#allocation1] ss:$2 sm:$0xff] %v877_v1 }
  0x41   : > { %v243_v11 = vld.sshfl [vmem:[#allocation1 + $0x10] sm:$0xff pattern:$0x75316420] }
  0x42   : > { %266 = vst [vmem:[#allocation1 + $0x11] ss:$2 sm:$0xff] %v260_v10  ;;  %248 = vrot.lane.b32.xlu2 %v243_v11, %s761_s30 }
  0x43   : > { %v241_v12 = vld.sshfl [vmem:[#allocation1] sm:$0xff pattern:$0x75316420]  ;;  %v242_v13 = vld.sshfl [vmem:[#allocation1 + $0x8] sm:$0xff pattern:$0x75316420] }
  0x44   : > { %264 = vst [vmem:[#allocation1 + $0x1] ss:$2 sm:$0xff] %v877_v1 }
  0x49   : > { %v269_v15 = vld.sshfl [vmem:[#allocation1 + $0x10] sm:$0xff pattern:$0x75316420] }
  0x4a   : > { %274 = vrot.lane.b32.xlu0 %v269_v15, %s762_s4  ;;  %291 = vst [vmem:[#allocation1 + $0x10] ss:$2 sm:$0xff] %v286_v14 }
  0x4b   : > { %v267_v16 = vld.sshfl [vmem:[#allocation1] sm:$0xff pattern:$0x75316420]  ;;  %v268_v17 = vld.sshfl [vmem:[#allocation1 + $0x8] sm:$0xff pattern:$0x75316420] }
  0x4c   : > { %289 = vst [vmem:[#allocation1] ss:$2 sm:$0xff] %v877_v1 }
  0x51   : > { %v294_v19 = vld.sshfl [vmem:[#allocation1 + $0x10] sm:$0xff pattern:$0x75316420] }
  0x52   : > { %299 = vrot.lane.b32.xlu0 %v294_v19, %s763_s5  ;;  %317 = vst [vmem:[#allocation1 + $0x11] ss:$2 sm:$0xff] %v311_v18 }
  0x53   : > { %v292_v20 = vld.sshfl [vmem:[#allocation1] sm:$0xff pattern:$0x75316420]  ;;  %v293_v21 = vld.sshfl [vmem:[#allocation1 + $0x8] sm:$0xff pattern:$0x75316420] }
  0x54   : > { %295 = vrot.lane.b32.xlu1 %v292_v20, %s763_s5  ;;  %297 = vrot.lane.b32.xlu2 %v293_v21, %s763_s5  ;;  %315 = vst [vmem:[#allocation1 + $0x1] ss:$2 sm:$0xff] %v877_v1 }
  0x59   : > { %v320_v23 = vld.sshfl [vmem:[#allocation1 + $0x10] sm:$0xff pattern:$0x75316420] }
  0x5a   : > { %342 = vst [vmem:[#allocation1 + $0x10] ss:$2 sm:$0xff] %v337_v22 }
  0x5b   : > { %v318_v24 = vld.sshfl [vmem:[#allocation1] sm:$0xff pattern:$0x75316420]  ;;  %v319_v25 = vld.sshfl [vmem:[#allocation1 + $0x8] sm:$0xff pattern:$0x75316420] }
  0x5c   : > { %325 = vrot.lane.b32.xlu1 %v320_v23, %s764_s6  ;;  %321 = vrot.lane.b32.xlu0 %v318_v24, %s764_s6  ;;  %340 = vst [vmem:[#allocation1] ss:$2 sm:$0xff] %v877_v1 }
  0x61   : > { %v345_v27 = vld.sshfl [vmem:[#allocation1 + $0x10] sm:$0xff pattern:$0x75316420] }
  0x62   : > { %368 = vst [vmem:[#allocation1 + $0x11] ss:$2 sm:$0xff] %v362_v26 }
  0x63   : > { %v344_v28 = vld.sshfl [vmem:[#allocation1 + $0x8] sm:$0xff pattern:$0x75316420]  ;;  %v343_v29 = vld.sshfl [vmem:[#allocation1] sm:$0xff pattern:$0x75316420] }
  0x64   : > { %323 = vrot.lane.b32.xlu1 %v319_v25, %s764_s6  ;;  %348 = vrot.lane.b32.xlu0 %v344_v28, %s765_s7  ;;  %366 = vst [vmem:[#allocation1 + $0x1] ss:$2 sm:$0xff] %v877_v1  ;;  %v436_v25 = vld [vmem:[%s987_s1] sm:$0xf] }
  0x65   : > { %346 = vrot.lane.b32.xlu2 %v343_v29, %s765_s7 }
  0x69   : > { %v371_v31 = vld.sshfl [vmem:[#allocation1 + $0x10] sm:$0xff pattern:$0x75316420] }
  0x6a   : > { %393 = vst [vmem:[#allocation1 + $0x10] ss:$2 sm:$0xff] %v388_v30 }
  0x6b   : > { %v370_v32 = vld.sshfl [vmem:[#allocation1 + $0x8] sm:$0xff pattern:$0x75316420]  ;;  %v369_v33 = vld.sshfl [vmem:[#allocation1] sm:$0xff pattern:$0x75316420] }
  0x6c   : > { %350 = vrot.lane.b32.xlu1 %v345_v27, %s765_s7  ;;  %391 = vst [vmem:[#allocation1] ss:$2 sm:$0xff] %v877_v1 }
  0x6d   : > { %376 = vrot.lane.b32.xlu2 %v371_v31, %s766_s8 }
  0x71   : > { %v396_v34 = vld.sshfl [vmem:[#allocation1 + $0x10] sm:$0xff pattern:$0x75316420] }
  0x72   : > { %401 = vrot.lane.b32.xlu0 %v396_v34, %s767_s9 }
  0x73   : > { %v395_v35 = vld.sshfl [vmem:[#allocation1 + $0x8] sm:$0xff pattern:$0x75316420]  ;;  %v394_v36 = vld.sshfl [vmem:[#allocation1] sm:$0xff pattern:$0x75316420] }
  0x74   : > { %372 = vrot.lane.b32.xlu1 %v369_v33, %s766_s8 }
  0x75   : > { %374 = vrot.lane.b32.xlu2 %v370_v32, %s766_s8 }
  0x7a   : > { %399 = vrot.lane.b32.xlu0 %v395_v35, %s767_s9 }
  0x7c   : > { %220 = vrot.lane.b32.xlu1 %v888_v9, %s760_s22 }
  0x7d   : > { %397 = vrot.lane.b32.xlu2 %v394_v36, %s767_s9  ;;  %s712_s9 = scalar_lea.hbm %s989_s3, 48 }
  0x82   : > { %218 = vrot.lane.b32.xlu0 %v886_v8, %s760_s22  ;;  %s515_s22 = scalar_lea.hbm %s989_s3, %s605_s26 }
  0x84   : > { %270 = vrot.lane.b32.xlu1 %v267_v16, %s762_s4 }
  0x85   : > { %244 = vrot.lane.b32.xlu2 %v241_v12, %s761_s30 }
  0x8a   : > { %246 = vrot.lane.b32.xlu0 %v242_v13, %s761_s30  ;;  %s517_s30 = sshll.u32 %s188_s27, 4  ;;  %s518_s30 = int_to_ptr.vmem [resolvable:$true] %s517_s30 }
  0x8d   : > { %272 = vrot.lane.b32.xlu2 %v268_v17, %s762_s4  ;;  %s519_s4 = sshll.u32 %s515_s22, 4  ;;  %s520_s4 = int_to_ptr.hbm [resolvable:$true] %s519_s4 }
  0x8e   : > { %s706_s5 = sshra.s32 %s520_s4, 4  ;;  %s707_s5 = int_to_ptr.hbm [resolvable:$true] %s706_s5 }
  0x8f   : > { %s708_s6 = scalar_lea.hbm %s707_s5, 24  ;;  %p713_p3 = scmp.lt.s32.totalorder %s707_s5, %s989_s3 }
  0x90   : > { %p709_p6 = scmp.ne.s32.totalorder %s707_s5, %s708_s6  ;;  %p714_p4 = scmp.lt.s32.totalorder %s712_s9, %s708_s6 }
  0x92   : > { %440 = vperm.xlu0 %661, %v437_v3   ;;  %p710_p13 = pnand %p709_p6, %p835_p11  ;;  %p715_p5 = por %p714_p4, %p713_p3 }
  0x94   : > { %p711_p2 = pneg %p710_p13 }
  0x96   : > { %p716_p7 = pnand %p715_p5, %p711_p2 }
  0x9c   : > { %v915_v37 = vpop.permute.xlu2 %248 }
  0x9d   : > { %258 = vst.msk [vmem:[#allocation2 + $0x28] sm:$0xf] %vm205_vm0, %v915_v37 }
  0xac   : > { %v919_v38 = vpop.permute.xlu1 %222 }
  0xad   : > { %233 = vst.msk [vmem:[#allocation2 + $0x10] sm:$0xf0] %vm232_vm1, %v919_v38 }
  0xae   : > { %v298_v39 = vpop.permute.xlu2 %297 }
  0xb4   : > { %v414_v14 = vld [vmem:[#allocation2 + $0x10] sm:$0xff] }
  0xbc   : > { %v275_v40 = vpop.permute.xlu0 %274 }
  0xbd   : > { %284 = vst.msk [vmem:[#allocation2 + $0x28] sm:$0xf0] %vm232_vm1, %v275_v40 }
  0xbf   : > { %v347_v41 = vpop.permute.xlu2 %346 }
  0xc4   : > { %v300_v42 = vpop.permute.xlu0 %299  ;;  %v417_v15 = vld [vmem:[#allocation2 + $0x28] sm:$0xff] }
  0xc5   : > { %v303_v43 = vsel %vm301_vm2, %v298_v39, %v300_v42  ;;  %309 = vst.msk [vmem:[#allocation2 + $0x40] sm:$0xf] %vm205_vm0, %v300_v42  ;;  %v429_v19 = vpack.c.bf16 %v417_v15, %v414_v14 }
  0xc6   : > { %308 = vst [vmem:[#allocation2 + $0x38] sm:$0xf] %v303_v43  ;;  %v296_v44 = vpop.permute.xlu1 %295 }
  0xc7   : > { %v302_v45 = vsel %vm301_vm2, %v296_v44, %v298_v39  ;;  %v377_v46 = vpop.permute.xlu2 %376 }
  0xc8   : > { %307 = vst [vmem:[#allocation2 + $0x30] sm:$0xf] %v302_v45 }
  0xc9   : > { %386 = vst.msk [vmem:[#allocation2 + $0x58] sm:$0xf0] %vm232_vm1, %v377_v46 }
  0xce   : > { %v326_v47 = vpop.permute.xlu1 %325  ;;  %v322_v48 = vpop.permute.xlu0 %321 }
  0xcf   : > { %335 = vst.msk [vmem:[#allocation2 + $0x40] sm:$0xf0] %vm232_vm1, %v326_v47  ;;  %v375_v49 = vpop.permute.xlu2 %374 }
  0xd0   : > { %v380_v50 = vsel %vm378_vm3, %v375_v49, %v377_v46 }
  0xd1   : > { %385 = vst [vmem:[#allocation2 + $0x50] sm:$0xf0] %v380_v50 }
  0xd6   : > { %v324_v51 = vpop.permute.xlu1 %323  ;;  %v349_v52 = vpop.permute.xlu0 %348  ;;  %v420_v12 = vld [vmem:[#allocation2 + $0x40] sm:$0xff] }
  0xd7   : > { %v328_v53 = vsel %vm327_vm4, %v322_v48, %v324_v51  ;;  %v329_v54 = vsel %vm327_vm4, %v324_v51, %v326_v47  ;;  %v353_v55 = vsel %vm352_vm5, %v347_v41, %v349_v52  ;;  %v398_v56 = vpop.permute.xlu2 %397 }
  0xd8   : > { %333 = vst [vmem:[#allocation2 + $0x30] sm:$0xf0] %v328_v53 }
  0xd9   : > { %334 = vst [vmem:[#allocation2 + $0x38] sm:$0xf0] %v329_v54 }
  0xda   : > { %358 = vst [vmem:[#allocation2 + $0x48] sm:$0xf] %v353_v55 }
  0xde   : > { %v351_v57 = vpop.permute.xlu1 %350 }
  0xdf   : > { %v354_v58 = vsel %vm352_vm5, %v349_v52, %v351_v57  ;;  %360 = vst.msk [vmem:[#allocation2 + $0x58] sm:$0xf] %vm205_vm0, %v351_v57  ;;  %v929_v59 = vpop.permute.xlu2 %244  ;;  %v418_v30 = vld [vmem:[#allocation2 + $0x30] sm:$0xff] }
  0xe0   : > { %359 = vst [vmem:[#allocation2 + $0x50] sm:$0xf] %v354_v58  ;;  %v419_v32 = vld [vmem:[#allocation2 + $0x38] sm:$0xff] }
  0xe4   : > { %v402_v60 = vpop.permute.xlu0 %401 }
  0xe5   : > { %411 = vst.msk [vmem:[#allocation2 + $0x70] sm:$0xf] %vm205_vm0, %v402_v60 }
  0xe6   : > { %v373_v61 = vpop.permute.xlu1 %372  ;;  %v423_v11 = vld [vmem:[#allocation2 + $0x58] sm:$0xff] }
  0xe7   : > { %v379_v62 = vsel %vm378_vm3, %v373_v61, %v375_v49  ;;  %v273_v63 = vpop.permute.xlu2 %272  ;;  %v432_v13 = vpack.c.bf16 %v423_v11, %v420_v12  ;;  %v422_v29 = vld [vmem:[#allocation2 + $0x50] sm:$0xff] }
  0xe8   : > { %384 = vst [vmem:[#allocation2 + $0x48] sm:$0xf0] %v379_v62  ;;  %v278_v0 = vsel %vm276_vm6, %v273_v63, %v275_v40  ;;  %v431_v34 = vpack.c.bf16 %v422_v29, %v419_v32 }
  0xe9   : > { %283 = vst [vmem:[#allocation2 + $0x20] sm:$0xf0] %v278_v0 }
  0xec   : > { %v400_v1 = vpop.permute.xlu0 %399  ;;  %v426_v2 = vld [vmem:[#allocation2 + $0x70] sm:$0xf] }
  0xed   : > { %v404_v4 = vsel %vm403_vm7, %v398_v56, %v400_v1  ;;  %v405_v5 = vsel %vm403_vm7, %v400_v1, %v402_v60  ;;  %v435_v6 = vpack.c.bf16 %v426_v2, %v426_v2 }
  0xee   : > { %v221_v8 = vpop.permute.xlu1 %220  ;;  %409 = vst [vmem:[#allocation2 + $0x60] sm:$0xf] %v404_v4 }
  0xef   : > { %v226_v9 = vsel %vm224_vm8, %v221_v8, %v919_v38  ;;  %410 = vst [vmem:[#allocation2 + $0x68] sm:$0xf] %v405_v5  ;;  %v455_v10 = vsel %vm447_vm9, %v435_v6, 0  ;;  %v421_v27 = vld [vmem:[#allocation2 + $0x48] sm:$0xff] }
  0xf0   : > { %231 = vst [vmem:[#allocation2 + $0x8] sm:$0xf0] %v226_v9  ;;  %488 = vmatpush.bf16.msra.mxu2 %v455_v10  ;;  %v430_v31 = vpack.c.bf16 %v421_v27, %v418_v30 }
  0xf4   : > { %489 = vmatpush.bf16.msra.mxu2 %v432_v13  ;;  %v219_v16 = vpop.permute.xlu0 %218 }
  0xf5   : > { %v225_v17 = vsel %vm224_vm8, %v219_v16, %v221_v8  ;;  %v424_v18 = vld [vmem:[#allocation2 + $0x60] sm:$0xf] }
  0xf6   : > { %230 = vst [vmem:[#allocation2] sm:$0xf0] %v225_v17  ;;  %v433_v20 = vpack.c.bf16 %v424_v18, %v424_v18  ;;  %v425_v21 = vld [vmem:[#allocation2 + $0x68] sm:$0xf]  ;;  %v271_v22 = vpop.permute.xlu1 %270 }
  0xf7   : > { %v434_v23 = vpack.c.bf16 %v425_v21, %v425_v21  ;;  %v277_v24 = vsel %vm276_vm6, %v271_v22, %v273_v63  ;;  %v413_v41 = vld [vmem:[#allocation2 + $0x8] sm:$0xff] }
  0xf8   : > { %490 = vmatpush.bf16.msra.mxu2 %v429_v19  ;;  %v449_v26 = vsel %vm447_vm9, %v433_v20, 0  ;;  %282 = vst [vmem:[#allocation2 + $0x18] sm:$0xf0] %v277_v24 }
  0xf9   : > { %462 = vmatpush.bf16.msra.mxu0 %v449_v26  ;;  %v452_v28 = vsel %vm447_vm9, %v434_v23, 0 }
  0xfa   : > { %475 = vmatpush.bf16.msra.mxu1 %v452_v28 }
  0xfb   : > { %597 = vmatmul.msk.bf16.vlgmr.msra.gmra.mxu2 %vm443_vm10, %v436_v25 }
  0xfc   : > { %v247_v33 = vpop.permute.xlu0 %246 }
  0xfd   : > { %v251_v35 = vsel %vm250_vm11, %v929_v59, %v247_v33  ;;  %v252_v36 = vsel %vm250_vm11, %v247_v33, %v915_v37  ;;  %463 = vmatpush.bf16.msra.mxu0 %v430_v31  ;;  %v412_v38 = vld [vmem:[#allocation2] sm:$0xff] }
  0xfe   : > { %256 = vst [vmem:[#allocation2 + $0x18] sm:$0xf] %v251_v35  ;;  %476 = vmatpush.bf16.msra.mxu1 %v431_v34 }
  0xff   : > { %257 = vst [vmem:[#allocation2 + $0x20] sm:$0xf] %v252_v36 }
 0x104   : > { %v441_v44 = vpop.permute.xlu0 %440 }
 0x105   : > { %v415_v39 = vld [vmem:[#allocation2 + $0x18] sm:$0xff] }
 0x106   : > { %v427_v40 = vpack.c.bf16 %v415_v39, %v412_v38  ;;  %v416_v42 = vld [vmem:[#allocation2 + $0x20] sm:$0xff] }
 0x107   : > { %v428_v43 = vpack.c.bf16 %v416_v42, %v413_v41 }
 0x108   : > { %464 = vmatpush.bf16.msra.mxu0 %v427_v40 }
 0x109   : > { %477 = vmatpush.bf16.msra.mxu1 %v428_v43 }
 0x10b   : > { %595 = vmatmul.msk.bf16.vlgmr.msra.gmra.mxu0 %vm443_vm10, %v436_v25 }
 0x10c   : > { %596 = vmatmul.msk.bf16.vlgmr.msra.gmra.mxu1 %vm443_vm10, %v436_v25 }
 0x17e   : > { %v492_v37 = vpop.f32.mrf.mxu2 }
 0x17f   : > { %v493_v45 = vadd.f32 %v492_v37, %v441_v44 }
 0x181   : > { %v498_v46 = vmax.f32 %v493_v45, 0.0 }
 0x183   : > { %502 = vst.msk [vmem:[%s188_s27 + $0x10] sm:$0xff] %vm501_vm12, %v498_v46 }
 0x186   : > { %v494_v47 = vpop.f32.mrf.mxu2 }
 0x188   : > { %v466_v48 = vpop.f32.mrf.mxu0 }
 0x189   : > { %v467_v49 = vadd.f32 %v466_v48, %v441_v44  ;;  %v479_v50 = vpop.f32.mrf.mxu1 }
 0x18a   : > { %v480_v51 = vadd.f32 %v479_v50, %v441_v44 }
 0x18b   : > { %v496_v52 = vmax.f32 %v467_v49, 0.0 }
 0x18c   : > { %v497_v53 = vmax.f32 %v480_v51, 0.0 }
 0x18d   : > { %499 = vst [vmem:[%s188_s27] sm:$0xff] %v496_v52 }
 0x18e   : > { %500 = vst [vmem:[%s188_s27 + $0x8] sm:$0xff] %v497_v53 }
 0x18f   : > { %719 = shalt.err (!%p716_p7)
}
 0x190   : > { %608 = dma.vmem_to_hbm [thread:$0]  (%p835_p11), %s518_s30, 384, %s520_s4, %s504_s16   ;;  %v468_v54 = vpop.f32.mrf.mxu0 }
 0x191   : > { %v481_v55 = vpop.f32.mrf.mxu1 }
 0x192 PF: > { %s531_s25 = sand.u32 1, %s746_s12   ;;  %p615_p8 = pnand %p592_p9, %p839_p12 }
 0x193   : > { %s532_s17 = scalar_lea.sflag [#allocation5], %s531_s25 }
 0x194   : > { %p616_p10 = pneg %p615_p8 }
 0x196   : > { %741 = dma.done.wait (%p616_p10), %s532_s17, 384  }
 0x197   : > { %743 = vsyncadd (%p616_p10), %s532_s17, 4294966912  ;;  %p16_p11 = scmp.ge.s32.totalorder %s814_s18, 4   ;;  %s994_s12 = smov %s750_s13 }
 0x198   : > { %s995_s13 = smov %s754_s14  ;;  %s996_s14 = smov %s826_s21 }
 0x199   : > { %s997_s15 = smov %s814_s18  ;;  %18 = sbr.rel (!%p16_p11) target bundleno = 5 (0x5), region = 90 }
 0x19e   :  { %538 = vsyncpa [#allocation4], 1 }
 0x19f   :  { %540 = vsyncpa [#allocation4 + $0x1], 1 }
 0x1a0   :  { %541 = vsyncpa [#allocation5], 1 }
 0x1a1   :  { %543 = vsyncpa [#allocation5 + $0x1], 1 }

</bundles_post_ra>
